<compile_context>
chip_gen: v7x
topology: tpu7x:2x2x1
jax: 0.10.0
libtpu: 0.0.40
codegen_flags: <defaults>
</compile_context>

<pallas_src>
import math

import jax
import jax.numpy as jnp
from jax import lax
from jax.experimental import pallas as pl
from jax.experimental.pallas import tpu as pltpu


def _round_up(n, m):
    return ((n + m - 1) // m) * m


def _mish_fast(x):
    # mish(x) = x * tanh(softplus(x)); tanh(softplus(x)) = t(t+2)/(t(t+2)+2), t=e^x.
    xc = jnp.minimum(x, 20.0)            # formula saturates to 1 long before overflow
    t = jnp.exp(xc)
    num = t * (t + 2.0)
    den = num + 2.0
    r = pl.reciprocal(den, approx=True)
    r = r * (2.0 - den * r)              # one Newton step (VPU) -> ~f32 exact
    return x * (num * r)


def _mish_ref(x):
    return x * jnp.tanh(jnp.logaddexp(0.0, x))


def _make_encoder_block_kernel(C_in, C_out, K, pad, L, L_out, L_lane, chunk, Bt,
                               groups, eps):
    C_per_g = C_out // groups
    L_f = float(L_out)
    inv_gl = 1.0 / float(C_per_g * L_out)
    # first output column that some conv tap can no longer reach (right zero fringe)
    r0 = min(L_out, L + pad - (K - 1))

    def group_mean(col):
        # (C_out, 1) per-channel sums -> per-channel group means (VPU/XLU reductions,
        # no lane-width-1 MXU matmul).
        pieces = []
        for g in range(groups):
            seg = col[g * C_per_g:(g + 1) * C_per_g, :]
            tot = jnp.sum(seg, axis=0, keepdims=True)
            pieces.append(jnp.broadcast_to(tot, (C_per_g, 1)))
        cat = pieces[0] if groups == 1 else jnp.concatenate(pieces, axis=0)
        return cat * inv_gl

    def kernel(x_ref, w_ref, p_ref, o_ref, s_ref):
        bias = p_ref[:, 0:1]             # conv bias           (C_out, 1)
        gw = p_ref[:, 1:2]               # GroupNorm weight
        gb = p_ref[:, 2:3]               # GroupNorm bias

        for b in range(Bt):
            # ---- pass 1: conv as bf16 im2col MXU matmuls, one 128-aligned L chunk
            #      at a time; raw conv output is stashed in the output block and
            #      per-channel sum / sum-of-squares are accumulated on the fly. ----
            s1 = None
            s2 = None
            for c0 in range(0, L_lane, chunk):
                cw = min(chunk, L_lane - c0)
                # zero only the never-written "same"-padding / lane-alignment columns
                zl = min(c0 + cw, pad) - c0
                if zl > 0:
                    s_ref[:, 0:zl] = jnp.zeros((K * C_in, zl), jnp.bfloat16)
                zr = max(c0, r0) - c0
                if zr < cw:
                    s_ref[:, zr:cw] = jnp.zeros((K * C_in, cw - zr), jnp.bfloat16)
                # im2col fill: K shifted windows of x stacked along the contraction
                # axis (k-major rows match w_flat); all slices are static.
                for k in range(K):
                    j0 = max(0, pad - k)
                    j1 = min(L_out, L + pad - k)
                    a = max(j0, c0)
                    e = min(j1, c0 + cw)
                    if a < e:
                        src = a - pad + k
                        s_ref[k * C_in:(k + 1) * C_in, a - c0:e - c0] = (
                            x_ref[b, :, src:src + (e - a)].astype(jnp.bfloat16))
                # one MXU matmul per chunk, contraction depth K*C_in, f32 accumulate
                part = jnp.dot(w_ref[...], s_ref[:, 0:cw],
                               preferred_element_type=jnp.float32)    # (C_out, cw)
                o_ref[0, b, :, c0:c0 + cw] = part.astype(o_ref.dtype)
                cs1 = jnp.sum(part, axis=-1, keepdims=True)
                cs2 = jnp.sum(part * part, axis=-1, keepdims=True)
                s1 = cs1 if s1 is None else s1 + cs1
                s2 = cs2 if s2 is None else s2 + cs2

            # ---- GroupNorm stats: fold the conv bias in analytically and collapse
            #      GroupNorm (+ bias) into a single per-channel scale/shift. ----
            sum_y = s1 + L_f * bias
            sumsq_y = s2 + 2.0 * bias * s1 + L_f * (bias * bias)
            mean = group_mean(sum_y)
            msq = group_mean(sumsq_y)
            var = jnp.maximum(msq - mean * mean, 0.0)   # guard E[y^2]-E[y]^2 cancellation
            inv = lax.rsqrt(var + eps)
            scale = gw * inv                            # (C_out, 1)
            shift = gb + (bias - mean) * scale          # conv bias folded in here

            # ---- pass 2: one FMA sweep + Mish, lane-dense 128-aligned stores. ----
            for c0 in range(0, L_lane, chunk):
                cw = min(chunk, L_lane - c0)
                y = o_ref[0, b, :, c0:c0 + cw].astype(jnp.float32) * scale + shift
                o_ref[0, b, :, c0:c0 + cw] = _mish_fast(y).astype(o_ref.dtype)

    return kernel


def encoder_block_pallas(x, w, b, gn_w, gn_b, *, groups, stride=1, dilation=1,
                         eps=1e-5, out_dtype=None):
    """x: (B, C_in, L); w: (C_out, C_in, K); b / gn_w / gn_b: (C_out,)."""
    # EncoderBlock only constructs Conv1dSamePadding with dilation=1; stride=1 is
    # the module default and the only path implemented here.
    assert stride == 1 and dilation == 1  # TODO(synk): strided/dilated variant unused by EncoderBlock defaults
    B, C_in, L = x.shape
    C_out, _, K = w.shape
    assert C_out % groups == 0
    out_dtype = x.dtype if out_dtype is None else out_dtype   # bf16 output OK on v5e

    pad = math.ceil((1 - stride + dilation * (K - 1)) / 2)
    cut_last = (K % 2 == 0) and (stride == 1) and (dilation % 2 == 1)
    L_conv = L + 2 * pad - dilation * (K - 1)
    L_out = L_conv - 1 if cut_last else L_conv               # == L for stride-1 same pad

    # lane geometry: pad the output length to a multiple of 128 so every matmul,
    # FMA and store is lane-dense; the wrapper slices the tail off afterwards.
    L_lane = _round_up(max(L_out, 1), 128)
    chunk = min(L_lane, 512)        # in-kernel L tile (bounds im2col scratch / vregs)
    # batch elements per grid step: amortize per-step overhead and widen lanes when
    # L is small (Bt * L_lane <= 512 lanes of conv output per batch step).
    bt_cap = max(1, 512 // L_lane)
    Bt = 1
    for d in range(1, B + 1):
        if B % d == 0 and d <= bt_cap:
            Bt = d
    n_bt = B // Bt

    # Lane-dense, k-major flattened weights (C_out, K*C_in) in bf16 (MXU-native);
    # row order matches the in-kernel im2col (k outer, c_in inner).
    w_flat = jnp.transpose(w, (0, 2, 1)).reshape(C_out, K * C_in).astype(jnp.bfloat16)
    # conv bias / GroupNorm affine packed into a single (C_out, 3) operand.
    params = jnp.stack([b, gn_w, gn_b], axis=1).astype(jnp.float32)

    kernel = _make_encoder_block_kernel(C_in, C_out, K, pad, L, L_out, L_lane,
                                        chunk, Bt, groups, eps)

    xbytes = x.dtype.itemsize
    obytes = jnp.dtype(out_dtype).itemsize
    vmem_est = (2 * Bt * C_in * L * xbytes            # x block (double-buffered)
                + 2 * Bt * C_out * L_lane * obytes    # out block (double-buffered)
                + K * C_in * chunk * 2                # bf16 im2col scratch
                + C_out * K * C_in * 2 + C_out * 3 * 4 + (1 << 20))
    vmem_limit = int(min(64 * 2**20, max(32 * 2**20, 2 * vmem_est)))

    # TODO(synk): for extremely long L (x / out blocks alone exceeding VMEM), add an
    # L grid axis ("arbitrary") with a K-1 halo block and accumulate-then-normalize
    # GroupNorm (@pl.when finalize); the in-kernel chunking above already bounds the
    # K-wide im2col working set.
    out_pad = pl.pallas_call(
        kernel,
        out_shape=jax.ShapeDtypeStruct((n_bt, Bt, C_out, L_lane), out_dtype),
        grid_spec=pltpu.PrefetchScalarGridSpec(
            num_scalar_prefetch=0,
            grid=(n_bt,),
            in_specs=[
                pl.BlockSpec((Bt, C_in, L), lambda g: (g, 0, 0)),
                pl.BlockSpec((C_out, K * C_in), lambda g: (0, 0)),
                pl.BlockSpec((C_out, 3), lambda g: (0, 0)),
            ],
            out_specs=pl.BlockSpec((1, Bt, C_out, L_lane), lambda g: (g, 0, 0, 0)),
            scratch_shapes=[pltpu.VMEM((K * C_in, chunk), jnp.bfloat16)],
        ),
        compiler_params=pltpu.CompilerParams(
            dimension_semantics=("parallel",),        # batch-independent -> megacore
            vmem_limit_bytes=vmem_limit),
    )(x, w_flat, params)

    # drop the lane padding and restore the (B, C_out, L_out) layout (pure layout
    # plumbing in the wrapper; no transpose needed with the (n_bt, Bt, ...) order).
    out = out_pad[..., :L_out].reshape(B, C_out, L_out)
    return out


def encoder_block_ref(x, w, b, gn_w, gn_b, *, groups, eps=1e-5):
    """Pure-JAX reference mirroring the PyTorch module."""
    C_out, _, K = w.shape
    pad = math.ceil((K - 1) / 2)
    y = lax.conv_general_dilated(
        x, w, window_strides=(1,), padding=[(pad, pad)],
        dimension_numbers=("NCH", "OIH", "NCH"))
    y = y + b[None, :, None]
    if K % 2 == 0:
        y = y[:, :, :-1]
    B, C, L = y.shape
    g = y.reshape(B, groups, C // groups, L)
    mean = g.mean(axis=(2, 3), keepdims=True)
    var = ((g - mean) ** 2).mean(axis=(2, 3), keepdims=True)
    normed = ((g - mean) / jnp.sqrt(var + eps)).reshape(B, C, L)
    y = normed * gn_w[None, :, None] + gn_b[None, :, None]
    return _mish_ref(y)


def _check(key, *, B, C_in, L, C_out, K, groups):
    kx, kw, kb, kgw, kgb = jax.random.split(key, 5)
    x = jax.random.normal(kx, (B, C_in, L), dtype=jnp.float32)
    w = jax.random.normal(kw, (C_out, C_in, K), dtype=jnp.float32) * 0.1
    b = jax.random.normal(kb, (C_out,), dtype=jnp.float32) * 0.1
    gn_w = 1.0 + 0.1 * jax.random.normal(kgw, (C_out,), dtype=jnp.float32)
    gn_b = 0.1 * jax.random.normal(kgb, (C_out,), dtype=jnp.float32)

    out = jax.block_until_ready(
        encoder_block_pallas(x, w, b, gn_w, gn_b, groups=groups))
    assert out.shape == (B, C_out, L), out.shape

    # exact-f32 module semantics (loose tolerance: MXU operands are bf16)
    ref = encoder_block_ref(x, w, b, gn_w, gn_b, groups=groups)
    err = float(jnp.max(jnp.abs(out - ref)))
    assert jnp.allclose(out, ref, atol=5e-2, rtol=5e-2), err

    # bf16-matched reference isolates algorithmic error from expected quantization
    xq = x.astype(jnp.bfloat16).astype(jnp.float32)
    wq = w.astype(jnp.bfloat16).astype(jnp.float32)
    refq = encoder_block_ref(xq, wq, b, gn_w, gn_b, groups=groups)
    errq = float(jnp.max(jnp.abs(out - refq)))
    assert jnp.allclose(out, refq, atol=4e-3, rtol=4e-3), errq


if __name__ == "__main__":
    key = jax.random.PRNGKey(0)
    k1, k2, k3 = jax.random.split(key, 3)
    # Shapes consistent with EncoderBlock(in_channels=4, out_channels=8,
    # kernel_size=3, groups=2) applied to x of shape (B=2, C=4, L=16).
    _check(k1, B=2, C_in=4, L=16, C_out=8, K=3, groups=2)
    # Even kernel (cut_last_element path), ragged L (two in-kernel L chunks), Bt=1.
    _check(k2, B=2, C_in=8, L=650, C_out=16, K=4, groups=4)
    # Pointwise conv (K=1, pad=0), Bt=4 batch packing per grid step.
    _check(k3, B=4, C_in=3, L=10, C_out=6, K=1, groups=1)
    print("KERNEL_OK")
</pallas_src>

<mosaic_0001>
module attributes {stable_mosaic.version = 11 : i64} {
  func.func @kernel(%arg0: i32, %arg1: memref<2x4x16xf32, #tpu.memory_space<vmem>>, %arg2: memref<8x12xbf16, #tpu.memory_space<vmem>>, %arg3: memref<8x3xf32, #tpu.memory_space<vmem>>, %arg4: memref<1x2x8x128xf32, #tpu.memory_space<vmem>>, %arg5: memref<12x128xbf16, #tpu.memory_space<vmem>>) attributes {dimension_semantics = [#tpu.dimension_semantics<parallel>], iteration_bounds = array<i64: 1>, scalar_prefetch = 0 : i64, scratch_operands = 1 : i64, tpu.core_type = #tpu.core_type<tc>, window_params = [{transform_indices = @transform_0, window_bounds = array<i64: 2, 4, 16>}, {pipeline_mode = #tpu.pipeline_mode<synchronous>, transform_indices = @transform_1, window_bounds = array<i64: 8, 12>}, {pipeline_mode = #tpu.pipeline_mode<synchronous>, transform_indices = @transform_2, window_bounds = array<i64: 8, 3>}, {transform_indices = @transform_3, window_bounds = array<i64: 1, 2, 8, 128>}]} {
    %c0 = arith.constant 0 : index
    %c0_0 = arith.constant 0 : index
    %0 = vector.load %arg3[%c0, %c0_0] : memref<8x3xf32, #tpu.memory_space<vmem>>, vector<8x1xf32>
    %c0_1 = arith.constant 0 : index
    %c1 = arith.constant 1 : index
    %1 = vector.load %arg3[%c0_1, %c1] : memref<8x3xf32, #tpu.memory_space<vmem>>, vector<8x1xf32>
    %c0_2 = arith.constant 0 : index
    %c2 = arith.constant 2 : index
    %2 = vector.load %arg3[%c0_2, %c2] : memref<8x3xf32, #tpu.memory_space<vmem>>, vector<8x1xf32>
    %cst = arith.constant 0.000000e+00 : bf16
    %3 = vector.broadcast %cst : bf16 to vector<12x1xbf16>
    %c0_3 = arith.constant 0 : index
    %c0_4 = arith.constant 0 : index
    %4 = vector.load %arg5[%c0_3, %c0_4] : memref<12x128xbf16, #tpu.memory_space<vmem>>, vector<12x1xbf16>
    tpu.vector_store %arg5[%c0_3, %c0_4], %3 {strides = array<i32>} : memref<12x128xbf16, #tpu.memory_space<vmem>>, vector<12x1xbf16>,
    %cst_5 = arith.constant 0.000000e+00 : bf16
    %5 = vector.broadcast %cst_5 : bf16 to vector<12x113xbf16>
    %c0_6 = arith.constant 0 : index
    %c15 = arith.constant 15 : index
    %6 = vector.load %arg5[%c0_6, %c15] : memref<12x128xbf16, #tpu.memory_space<vmem>>, vector<12x113xbf16>
    tpu.vector_store %arg5[%c0_6, %c15], %5 {strides = array<i32>} : memref<12x128xbf16, #tpu.memory_space<vmem>>, vector<12x113xbf16>,
    %c0_7 = arith.constant 0 : index
    %c0_8 = arith.constant 0 : index
    %c0_9 = arith.constant 0 : index
    %7 = vector.load %arg1[%c0_7, %c0_8, %c0_9] : memref<2x4x16xf32, #tpu.memory_space<vmem>>, vector<1x4x15xf32>
    %8 = vector.shape_cast %7 : vector<1x4x15xf32> to vector<4x15xf32>
    %9 = arith.truncf %8 : vector<4x15xf32> to vector<4x15xbf16>
    %c0_10 = arith.constant 0 : index
    %c1_11 = arith.constant 1 : index
    %10 = vector.load %arg5[%c0_10, %c1_11] : memref<12x128xbf16, #tpu.memory_space<vmem>>, vector<4x15xbf16>
    tpu.vector_store %arg5[%c0_10, %c1_11], %9 {strides = array<i32>} : memref<12x128xbf16, #tpu.memory_space<vmem>>, vector<4x15xbf16>,
    %c0_12 = arith.constant 0 : index
    %c0_13 = arith.constant 0 : index
    %c0_14 = arith.constant 0 : index
    %11 = vector.load %arg1[%c0_12, %c0_13, %c0_14] : memref<2x4x16xf32, #tpu.memory_space<vmem>>, vector<1x4x16xf32>
    %12 = vector.shape_cast %11 : vector<1x4x16xf32> to vector<4x16xf32>
    %13 = arith.truncf %12 : vector<4x16xf32> to vector<4x16xbf16>
    %c4 = arith.constant 4 : index
    %c0_15 = arith.constant 0 : index
    %14 = vector.load %arg5[%c4, %c0_15] : memref<12x128xbf16, #tpu.memory_space<vmem>>, vector<4x16xbf16>
    tpu.vector_store %arg5[%c4, %c0_15], %13 {strides = array<i32>} : memref<12x128xbf16, #tpu.memory_space<vmem>>, vector<4x16xbf16>,
    %c0_16 = arith.constant 0 : index
    %c0_17 = arith.constant 0 : index
    %c1_18 = arith.constant 1 : index
    %15 = vector.load %arg1[%c0_16, %c0_17, %c1_18] : memref<2x4x16xf32, #tpu.memory_space<vmem>>, vector<1x4x15xf32>
    %16 = vector.shape_cast %15 : vector<1x4x15xf32> to vector<4x15xf32>
    %17 = arith.truncf %16 : vector<4x15xf32> to vector<4x15xbf16>
    %c8 = arith.constant 8 : index
    %c0_19 = arith.constant 0 : index
    %18 = vector.load %arg5[%c8, %c0_19] : memref<12x128xbf16, #tpu.memory_space<vmem>>, vector<4x15xbf16>
    tpu.vector_store %arg5[%c8, %c0_19], %17 {strides = array<i32>} : memref<12x128xbf16, #tpu.memory_space<vmem>>, vector<4x15xbf16>,
    %c0_20 = arith.constant 0 : index
    %c0_21 = arith.constant 0 : index
    %19 = vector.load %arg2[%c0_20, %c0_21] : memref<8x12xbf16, #tpu.memory_space<vmem>>, vector<8x12xbf16>
    %c0_22 = arith.constant 0 : index
    %c0_23 = arith.constant 0 : index
    %20 = vector.load %arg5[%c0_22, %c0_23] : memref<12x128xbf16, #tpu.memory_space<vmem>>, vector<12x128xbf16>
    %cst_24 = arith.constant dense<0.000000e+00> : vector<8x128xf32>
    %21 = tpu.matmul %19, %20, %cst_24 {dimension_numbers = #tpu.dot_dimension_numbers<[1], [0], [0], [1], [0, 0, 1, 1], [], []>} : vector<8x12xbf16>, vector<12x128xbf16>, vector<8x128xf32> -> vector<8x128xf32>
    %c0_25 = arith.constant 0 : index
    %c0_26 = arith.constant 0 : index
    %c0_27 = arith.constant 0 : index
    %c0_28 = arith.constant 0 : index
    %22 = vector.load %arg4[%c0_25, %c0_26, %c0_27, %c0_28] : memref<1x2x8x128xf32, #tpu.memory_space<vmem>>, vector<1x1x8x128xf32>
    %23 = vector.shape_cast %22 : vector<1x1x8x128xf32> to vector<8x128xf32>
    %24 = vector.shape_cast %21 : vector<8x128xf32> to vector<1x1x8x128xf32>
    tpu.vector_store %arg4[%c0_25, %c0_26, %c0_27, %c0_28], %24 {strides = array<i32>} : memref<1x2x8x128xf32, #tpu.memory_space<vmem>>, vector<1x1x8x128xf32>,
    %cst_29 = arith.constant dense<0.000000e+00> : vector<8xf32>
    %25 = vector.multi_reduction <add>, %21, %cst_29 [1] : vector<8x128xf32> to vector<8xf32>
    %26 = vector.shape_cast %25 : vector<8xf32> to vector<8x1xf32>
    %27 = arith.mulf %21, %21 : vector<8x128xf32>
    %cst_30 = arith.constant dense<0.000000e+00> : vector<8xf32>
    %28 = vector.multi_reduction <add>, %27, %cst_30 [1] : vector<8x128xf32> to vector<8xf32>
    %29 = vector.shape_cast %28 : vector<8xf32> to vector<8x1xf32>
    %cst_31 = arith.constant 1.600000e+01 : f32
    %30 = vector.broadcast %cst_31 : f32 to vector<8x1xf32>
    %31 = arith.mulf %30, %0 : vector<8x1xf32>
    %32 = arith.addf %26, %31 : vector<8x1xf32>
    %cst_32 = arith.constant 2.000000e+00 : f32
    %33 = vector.broadcast %cst_32 : f32 to vector<8x1xf32>
    %34 = arith.mulf %33, %0 : vector<8x1xf32>
    %35 = arith.mulf %34, %26 : vector<8x1xf32>
    %36 = arith.addf %29, %35 : vector<8x1xf32>
    %37 = arith.mulf %0, %0 : vector<8x1xf32>
    %cst_33 = arith.constant 1.600000e+01 : f32
    %38 = vector.broadcast %cst_33 : f32 to vector<8x1xf32>
    %39 = arith.mulf %38, %37 : vector<8x1xf32>
    %40 = arith.addf %36, %39 : vector<8x1xf32>
    %41 = vector.extract_strided_slice %32 {offsets = [0, 0], sizes = [4, 1], strides = [1, 1]} : vector<8x1xf32> to vector<4x1xf32>
    %cst_34 = arith.constant dense<0.000000e+00> : vector<1xf32>
    %42 = vector.multi_reduction <add>, %41, %cst_34 [0] : vector<4x1xf32> to vector<1xf32>
    %43 = vector.shape_cast %42 : vector<1xf32> to vector<1x1xf32>
    %44 = vector.shape_cast %43 : vector<1x1xf32> to vector<1x1xf32>
    %45 = vector.broadcast %44 : vector<1x1xf32> to vector<4x1xf32>
    %46 = vector.extract_strided_slice %32 {offsets = [4, 0], sizes = [4, 1], strides = [1, 1]} : vector<8x1xf32> to vector<4x1xf32>
    %cst_35 = arith.constant dense<0.000000e+00> : vector<1xf32>
    %47 = vector.multi_reduction <add>, %46, %cst_35 [0] : vector<4x1xf32> to vector<1xf32>
    %48 = vector.shape_cast %47 : vector<1xf32> to vector<1x1xf32>
    %49 = vector.shape_cast %48 : vector<1x1xf32> to vector<1x1xf32>
    %50 = vector.broadcast %49 : vector<1x1xf32> to vector<4x1xf32>
    %51 = tpu.concatenate %45, %50 in 0 : vector<4x1xf32>, vector<4x1xf32> -> vector<8x1xf32>
    %cst_36 = arith.constant 1.562500e-02 : f32
    %52 = vector.broadcast %cst_36 : f32 to vector<8x1xf32>
    %53 = arith.mulf %51, %52 : vector<8x1xf32>
    %54 = vector.extract_strided_slice %40 {offsets = [0, 0], sizes = [4, 1], strides = [1, 1]} : vector<8x1xf32> to vector<4x1xf32>
    %cst_37 = arith.constant dense<0.000000e+00> : vector<1xf32>
    %55 = vector.multi_reduction <add>, %54, %cst_37 [0] : vector<4x1xf32> to vector<1xf32>
    %56 = vector.shape_cast %55 : vector<1xf32> to vector<1x1xf32>
    %57 = vector.shape_cast %56 : vector<1x1xf32> to vector<1x1xf32>
    %58 = vector.broadcast %57 : vector<1x1xf32> to vector<4x1xf32>
    %59 = vector.extract_strided_slice %40 {offsets = [4, 0], sizes = [4, 1], strides = [1, 1]} : vector<8x1xf32> to vector<4x1xf32>
    %cst_38 = arith.constant dense<0.000000e+00> : vector<1xf32>
    %60 = vector.multi_reduction <add>, %59, %cst_38 [0] : vector<4x1xf32> to vector<1xf32>
    %61 = vector.shape_cast %60 : vector<1xf32> to vector<1x1xf32>
    %62 = vector.shape_cast %61 : vector<1x1xf32> to vector<1x1xf32>
    %63 = vector.broadcast %62 : vector<1x1xf32> to vector<4x1xf32>
    %64 = tpu.concatenate %58, %63 in 0 : vector<4x1xf32>, vector<4x1xf32> -> vector<8x1xf32>
    %cst_39 = arith.constant 1.562500e-02 : f32
    %65 = vector.broadcast %cst_39 : f32 to vector<8x1xf32>
    %66 = arith.mulf %64, %65 : vector<8x1xf32>
    %67 = arith.mulf %53, %53 : vector<8x1xf32>
    %68 = arith.subf %66, %67 : vector<8x1xf32>
    %cst_40 = arith.constant 0.000000e+00 : f32
    %69 = vector.broadcast %cst_40 : f32 to vector<8x1xf32>
    %70 = arith.maximumf %68, %69 : vector<8x1xf32>
    %cst_41 = arith.constant 9.99999974E-6 : f32
    %71 = vector.broadcast %cst_41 : f32 to vector<8x1xf32>
    %72 = arith.addf %70, %71 : vector<8x1xf32>
    %73 = math.rsqrt %72 : vector<8x1xf32>
    %74 = arith.mulf %1, %73 : vector<8x1xf32>
    %75 = arith.subf %0, %53 : vector<8x1xf32>
    %76 = arith.mulf %75, %74 : vector<8x1xf32>
    %77 = arith.addf %2, %76 : vector<8x1xf32>
    %c0_42 = arith.constant 0 : index
    %c0_43 = arith.constant 0 : index
    %c0_44 = arith.constant 0 : index
    %c0_45 = arith.constant 0 : index
    %78 = vector.load %arg4[%c0_42, %c0_43, %c0_44, %c0_45] : memref<1x2x8x128xf32, #tpu.memory_space<vmem>>, vector<1x1x8x128xf32>
    %79 = vector.shape_cast %78 : vector<1x1x8x128xf32> to vector<8x128xf32>
    %80 = vector.broadcast %74 : vector<8x1xf32> to vector<8x128xf32>
    %81 = arith.mulf %79, %80 : vector<8x128xf32>
    %82 = vector.broadcast %77 : vector<8x1xf32> to vector<8x128xf32>
    %83 = arith.addf %81, %82 : vector<8x128xf32>
    %cst_46 = arith.constant 2.000000e+01 : f32
    %84 = vector.broadcast %cst_46 : f32 to vector<8x128xf32>
    %85 = arith.minimumf %83, %84 : vector<8x128xf32>
    %86 = math.exp %85 : vector<8x128xf32>
    %cst_47 = arith.constant 2.000000e+00 : f32
    %87 = vector.broadcast %cst_47 : f32 to vector<8x128xf32>
    %88 = arith.addf %86, %87 : vector<8x128xf32>
    %89 = arith.mulf %86, %88 : vector<8x128xf32>
    %cst_48 = arith.constant 2.000000e+00 : f32
    %90 = vector.broadcast %cst_48 : f32 to vector<8x128xf32>
    %91 = arith.addf %89, %90 : vector<8x128xf32>
    %92 = tpu.reciprocal %91 {approx = true} : vector<8x128xf32> -> vector<8x128xf32>
    %93 = arith.mulf %91, %92 : vector<8x128xf32>
    %cst_49 = arith.constant 2.000000e+00 : f32
    %94 = vector.broadcast %cst_49 : f32 to vector<8x128xf32>
    %95 = arith.subf %94, %93 : vector<8x128xf32>
    %96 = arith.mulf %92, %95 : vector<8x128xf32>
    %97 = arith.mulf %89, %96 : vector<8x128xf32>
    %98 = arith.mulf %83, %97 : vector<8x128xf32>
    %c0_50 = arith.constant 0 : index
    %c0_51 = arith.constant 0 : index
    %c0_52 = arith.constant 0 : index
    %c0_53 = arith.constant 0 : index
    %99 = vector.load %arg4[%c0_50, %c0_51, %c0_52, %c0_53] : memref<1x2x8x128xf32, #tpu.memory_space<vmem>>, vector<1x1x8x128xf32>
    %100 = vector.shape_cast %99 : vector<1x1x8x128xf32> to vector<8x128xf32>
    %101 = vector.shape_cast %98 : vector<8x128xf32> to vector<1x1x8x128xf32>
    tpu.vector_store %arg4[%c0_50, %c0_51, %c0_52, %c0_53], %101 {strides = array<i32>} : memref<1x2x8x128xf32, #tpu.memory_space<vmem>>, vector<1x1x8x128xf32>,
    %cst_54 = arith.constant 0.000000e+00 : bf16
    %102 = vector.broadcast %cst_54 : bf16 to vector<12x1xbf16>
    %c0_55 = arith.constant 0 : index
    %c0_56 = arith.constant 0 : index
    %103 = vector.load %arg5[%c0_55, %c0_56] : memref<12x128xbf16, #tpu.memory_space<vmem>>, vector<12x1xbf16>
    tpu.vector_store %arg5[%c0_55, %c0_56], %102 {strides = array<i32>} : memref<12x128xbf16, #tpu.memory_space<vmem>>, vector<12x1xbf16>,
    %cst_57 = arith.constant 0.000000e+00 : bf16
    %104 = vector.broadcast %cst_57 : bf16 to vector<12x113xbf16>
    %c0_58 = arith.constant 0 : index
    %c15_59 = arith.constant 15 : index
    %105 = vector.load %arg5[%c0_58, %c15_59] : memref<12x128xbf16, #tpu.memory_space<vmem>>, vector<12x113xbf16>
    tpu.vector_store %arg5[%c0_58, %c15_59], %104 {strides = array<i32>} : memref<12x128xbf16, #tpu.memory_space<vmem>>, vector<12x113xbf16>,
    %c1_60 = arith.constant 1 : index
    %c0_61 = arith.constant 0 : index
    %c0_62 = arith.constant 0 : index
    %106 = vector.load %arg1[%c1_60, %c0_61, %c0_62] : memref<2x4x16xf32, #tpu.memory_space<vmem>>, vector<1x4x15xf32>
    %107 = vector.shape_cast %106 : vector<1x4x15xf32> to vector<4x15xf32>
    %108 = arith.truncf %107 : vector<4x15xf32> to vector<4x15xbf16>
    %c0_63 = arith.constant 0 : index
    %c1_64 = arith.constant 1 : index
    %109 = vector.load %arg5[%c0_63, %c1_64] : memref<12x128xbf16, #tpu.memory_space<vmem>>, vector<4x15xbf16>
    tpu.vector_store %arg5[%c0_63, %c1_64], %108 {strides = array<i32>} : memref<12x128xbf16, #tpu.memory_space<vmem>>, vector<4x15xbf16>,
    %c1_65 = arith.constant 1 : index
    %c0_66 = arith.constant 0 : index
    %c0_67 = arith.constant 0 : index
    %110 = vector.load %arg1[%c1_65, %c0_66, %c0_67] : memref<2x4x16xf32, #tpu.memory_space<vmem>>, vector<1x4x16xf32>
    %111 = vector.shape_cast %110 : vector<1x4x16xf32> to vector<4x16xf32>
    %112 = arith.truncf %111 : vector<4x16xf32> to vector<4x16xbf16>
    %c4_68 = arith.constant 4 : index
    %c0_69 = arith.constant 0 : index
    %113 = vector.load %arg5[%c4_68, %c0_69] : memref<12x128xbf16, #tpu.memory_space<vmem>>, vector<4x16xbf16>
    tpu.vector_store %arg5[%c4_68, %c0_69], %112 {strides = array<i32>} : memref<12x128xbf16, #tpu.memory_space<vmem>>, vector<4x16xbf16>,
    %c1_70 = arith.constant 1 : index
    %c0_71 = arith.constant 0 : index
    %c1_72 = arith.constant 1 : index
    %114 = vector.load %arg1[%c1_70, %c0_71, %c1_72] : memref<2x4x16xf32, #tpu.memory_space<vmem>>, vector<1x4x15xf32>
    %115 = vector.shape_cast %114 : vector<1x4x15xf32> to vector<4x15xf32>
    %116 = arith.truncf %115 : vector<4x15xf32> to vector<4x15xbf16>
    %c8_73 = arith.constant 8 : index
    %c0_74 = arith.constant 0 : index
    %117 = vector.load %arg5[%c8_73, %c0_74] : memref<12x128xbf16, #tpu.memory_space<vmem>>, vector<4x15xbf16>
    tpu.vector_store %arg5[%c8_73, %c0_74], %116 {strides = array<i32>} : memref<12x128xbf16, #tpu.memory_space<vmem>>, vector<4x15xbf16>,
    %c0_75 = arith.constant 0 : index
    %c0_76 = arith.constant 0 : index
    %118 = vector.load %arg2[%c0_75, %c0_76] : memref<8x12xbf16, #tpu.memory_space<vmem>>, vector<8x12xbf16>
    %c0_77 = arith.constant 0 : index
    %c0_78 = arith.constant 0 : index
    %119 = vector.load %arg5[%c0_77, %c0_78] : memref<12x128xbf16, #tpu.memory_space<vmem>>, vector<12x128xbf16>
    %cst_79 = arith.constant dense<0.000000e+00> : vector<8x128xf32>
    %120 = tpu.matmul %118, %119, %cst_79 {dimension_numbers = #tpu.dot_dimension_numbers<[1], [0], [0], [1], [0, 0, 1, 1], [], []>} : vector<8x12xbf16>, vector<12x128xbf16>, vector<8x128xf32> -> vector<8x128xf32>
    %c0_80 = arith.constant 0 : index
    %c1_81 = arith.constant 1 : index
    %c0_82 = arith.constant 0 : index
    %c0_83 = arith.constant 0 : index
    %121 = vector.load %arg4[%c0_80, %c1_81, %c0_82, %c0_83] : memref<1x2x8x128xf32, #tpu.memory_space<vmem>>, vector<1x1x8x128xf32>
    %122 = vector.shape_cast %121 : vector<1x1x8x128xf32> to vector<8x128xf32>
    %123 = vector.shape_cast %120 : vector<8x128xf32> to vector<1x1x8x128xf32>
    tpu.vector_store %arg4[%c0_80, %c1_81, %c0_82, %c0_83], %123 {strides = array<i32>} : memref<1x2x8x128xf32, #tpu.memory_space<vmem>>, vector<1x1x8x128xf32>,
    %cst_84 = arith.constant dense<0.000000e+00> : vector<8xf32>
    %124 = vector.multi_reduction <add>, %120, %cst_84 [1] : vector<8x128xf32> to vector<8xf32>
    %125 = vector.shape_cast %124 : vector<8xf32> to vector<8x1xf32>
    %126 = arith.mulf %120, %120 : vector<8x128xf32>
    %cst_85 = arith.constant dense<0.000000e+00> : vector<8xf32>
    %127 = vector.multi_reduction <add>, %126, %cst_85 [1] : vector<8x128xf32> to vector<8xf32>
    %128 = vector.shape_cast %127 : vector<8xf32> to vector<8x1xf32>
    %cst_86 = arith.constant 1.600000e+01 : f32
    %129 = vector.broadcast %cst_86 : f32 to vector<8x1xf32>
    %130 = arith.mulf %129, %0 : vector<8x1xf32>
    %131 = arith.addf %125, %130 : vector<8x1xf32>
    %cst_87 = arith.constant 2.000000e+00 : f32
    %132 = vector.broadcast %cst_87 : f32 to vector<8x1xf32>
    %133 = arith.mulf %132, %0 : vector<8x1xf32>
    %134 = arith.mulf %133, %125 : vector<8x1xf32>
    %135 = arith.addf %128, %134 : vector<8x1xf32>
    %136 = arith.mulf %0, %0 : vector<8x1xf32>
    %cst_88 = arith.constant 1.600000e+01 : f32
    %137 = vector.broadcast %cst_88 : f32 to vector<8x1xf32>
    %138 = arith.mulf %137, %136 : vector<8x1xf32>
    %139 = arith.addf %135, %138 : vector<8x1xf32>
    %140 = vector.extract_strided_slice %131 {offsets = [0, 0], sizes = [4, 1], strides = [1, 1]} : vector<8x1xf32> to vector<4x1xf32>
    %cst_89 = arith.constant dense<0.000000e+00> : vector<1xf32>
    %141 = vector.multi_reduction <add>, %140, %cst_89 [0] : vector<4x1xf32> to vector<1xf32>
    %142 = vector.shape_cast %141 : vector<1xf32> to vector<1x1xf32>
    %143 = vector.shape_cast %142 : vector<1x1xf32> to vector<1x1xf32>
    %144 = vector.broadcast %143 : vector<1x1xf32> to vector<4x1xf32>
    %145 = vector.extract_strided_slice %131 {offsets = [4, 0], sizes = [4, 1], strides = [1, 1]} : vector<8x1xf32> to vector<4x1xf32>
    %cst_90 = arith.constant dense<0.000000e+00> : vector<1xf32>
    %146 = vector.multi_reduction <add>, %145, %cst_90 [0] : vector<4x1xf32> to vector<1xf32>
    %147 = vector.shape_cast %146 : vector<1xf32> to vector<1x1xf32>
    %148 = vector.shape_cast %147 : vector<1x1xf32> to vector<1x1xf32>
    %149 = vector.broadcast %148 : vector<1x1xf32> to vector<4x1xf32>
    %150 = tpu.concatenate %144, %149 in 0 : vector<4x1xf32>, vector<4x1xf32> -> vector<8x1xf32>
    %cst_91 = arith.constant 1.562500e-02 : f32
    %151 = vector.broadcast %cst_91 : f32 to vector<8x1xf32>
    %152 = arith.mulf %150, %151 : vector<8x1xf32>
    %153 = vector.extract_strided_slice %139 {offsets = [0, 0], sizes = [4, 1], strides = [1, 1]} : vector<8x1xf32> to vector<4x1xf32>
    %cst_92 = arith.constant dense<0.000000e+00> : vector<1xf32>
    %154 = vector.multi_reduction <add>, %153, %cst_92 [0] : vector<4x1xf32> to vector<1xf32>
    %155 = vector.shape_cast %154 : vector<1xf32> to vector<1x1xf32>
    %156 = vector.shape_cast %155 : vector<1x1xf32> to vector<1x1xf32>
    %157 = vector.broadcast %156 : vector<1x1xf32> to vector<4x1xf32>
    %158 = vector.extract_strided_slice %139 {offsets = [4, 0], sizes = [4, 1], strides = [1, 1]} : vector<8x1xf32> to vector<4x1xf32>
    %cst_93 = arith.constant dense<0.000000e+00> : vector<1xf32>
    %159 = vector.multi_reduction <add>, %158, %cst_93 [0] : vector<4x1xf32> to vector<1xf32>
    %160 = vector.shape_cast %159 : vector<1xf32> to vector<1x1xf32>
    %161 = vector.shape_cast %160 : vector<1x1xf32> to vector<1x1xf32>
    %162 = vector.broadcast %161 : vector<1x1xf32> to vector<4x1xf32>
    %163 = tpu.concatenate %157, %162 in 0 : vector<4x1xf32>, vector<4x1xf32> -> vector<8x1xf32>
    %cst_94 = arith.constant 1.562500e-02 : f32
    %164 = vector.broadcast %cst_94 : f32 to vector<8x1xf32>
    %165 = arith.mulf %163, %164 : vector<8x1xf32>
    %166 = arith.mulf %152, %152 : vector<8x1xf32>
    %167 = arith.subf %165, %166 : vector<8x1xf32>
    %cst_95 = arith.constant 0.000000e+00 : f32
    %168 = vector.broadcast %cst_95 : f32 to vector<8x1xf32>
    %169 = arith.maximumf %167, %168 : vector<8x1xf32>
    %cst_96 = arith.constant 9.99999974E-6 : f32
    %170 = vector.broadcast %cst_96 : f32 to vector<8x1xf32>
    %171 = arith.addf %169, %170 : vector<8x1xf32>
    %172 = math.rsqrt %171 : vector<8x1xf32>
    %173 = arith.mulf %1, %172 : vector<8x1xf32>
    %174 = arith.subf %0, %152 : vector<8x1xf32>
    %175 = arith.mulf %174, %173 : vector<8x1xf32>
    %176 = arith.addf %2, %175 : vector<8x1xf32>
    %c0_97 = arith.constant 0 : index
    %c1_98 = arith.constant 1 : index
    %c0_99 = arith.constant 0 : index
    %c0_100 = arith.constant 0 : index
    %177 = vector.load %arg4[%c0_97, %c1_98, %c0_99, %c0_100] : memref<1x2x8x128xf32, #tpu.memory_space<vmem>>, vector<1x1x8x128xf32>
    %178 = vector.shape_cast %177 : vector<1x1x8x128xf32> to vector<8x128xf32>
    %179 = vector.broadcast %173 : vector<8x1xf32> to vector<8x128xf32>
    %180 = arith.mulf %178, %179 : vector<8x128xf32>
    %181 = vector.broadcast %176 : vector<8x1xf32> to vector<8x128xf32>
    %182 = arith.addf %180, %181 : vector<8x128xf32>
    %cst_101 = arith.constant 2.000000e+01 : f32
    %183 = vector.broadcast %cst_101 : f32 to vector<8x128xf32>
    %184 = arith.minimumf %182, %183 : vector<8x128xf32>
    %185 = math.exp %184 : vector<8x128xf32>
    %cst_102 = arith.constant 2.000000e+00 : f32
    %186 = vector.broadcast %cst_102 : f32 to vector<8x128xf32>
    %187 = arith.addf %185, %186 : vector<8x128xf32>
    %188 = arith.mulf %185, %187 : vector<8x128xf32>
    %cst_103 = arith.constant 2.000000e+00 : f32
    %189 = vector.broadcast %cst_103 : f32 to vector<8x128xf32>
    %190 = arith.addf %188, %189 : vector<8x128xf32>
    %191 = tpu.reciprocal %190 {approx = true} : vector<8x128xf32> -> vector<8x128xf32>
    %192 = arith.mulf %190, %191 : vector<8x128xf32>
    %cst_104 = arith.constant 2.000000e+00 : f32
    %193 = vector.broadcast %cst_104 : f32 to vector<8x128xf32>
    %194 = arith.subf %193, %192 : vector<8x128xf32>
    %195 = arith.mulf %191, %194 : vector<8x128xf32>
    %196 = arith.mulf %188, %195 : vector<8x128xf32>
    %197 = arith.mulf %182, %196 : vector<8x128xf32>
    %c0_105 = arith.constant 0 : index
    %c1_106 = arith.constant 1 : index
    %c0_107 = arith.constant 0 : index
    %c0_108 = arith.constant 0 : index
    %198 = vector.load %arg4[%c0_105, %c1_106, %c0_107, %c0_108] : memref<1x2x8x128xf32, #tpu.memory_space<vmem>>, vector<1x1x8x128xf32>
    %199 = vector.shape_cast %198 : vector<1x1x8x128xf32> to vector<8x128xf32>
    %200 = vector.shape_cast %197 : vector<8x128xf32> to vector<1x1x8x128xf32>
    tpu.vector_store %arg4[%c0_105, %c1_106, %c0_107, %c0_108], %200 {strides = array<i32>} : memref<1x2x8x128xf32, #tpu.memory_space<vmem>>, vector<1x1x8x128xf32>,
    return
  }
  func.func @transform_0(%arg0: i32) -> (i32, i32, i32) {
    %c0_i32 = arith.constant 0 : i32
    %c0_i32_0 = arith.constant 0 : i32
    %c0_i32_1 = arith.constant 0 : i32
    return %arg0, %c0_i32, %c0_i32_0 : i32, i32, i32
  }
  func.func @transform_1(%arg0: i32) -> (i32, i32) {
    %c0_i32 = arith.constant 0 : i32
    %c0_i32_0 = arith.constant 0 : i32
    %c0_i32_1 = arith.constant 0 : i32
    return %c0_i32, %c0_i32_0 : i32, i32
  }
  func.func @transform_2(%arg0: i32) -> (i32, i32) {
    %c0_i32 = arith.constant 0 : i32
    %c0_i32_0 = arith.constant 0 : i32
    %c0_i32_1 = arith.constant 0 : i32
    return %c0_i32, %c0_i32_0 : i32, i32
  }
  func.func @transform_3(%arg0: i32) -> (i32, i32, i32, i32) {
    %c0_i32 = arith.constant 0 : i32
    %c0_i32_0 = arith.constant 0 : i32
    %c0_i32_1 = arith.constant 0 : i32
    %c0_i32_2 = arith.constant 0 : i32
    return %arg0, %c0_i32, %c0_i32_0, %c0_i32_1 : i32, i32, i32, i32
  }
}

</mosaic_0001>

<bundles_post_ra>
// kernel: tpu_custom_call.1
= control target key start
LH: loop header
LB: loop body
LE: loop exit
PB: predicated region body
PF: predicated region fallthrough
CT: control target
= control target key end

     0   :  { %vm17_vm0 = vcmask 3072   ;;  %s492_s22 = smov 1   ;;  %v493_v9 = vmov 0   ;;  %vm21_vm1 = vcmask 1043576   ;;  %vm19_vm2 = vcmask 1024   ;;  %s618_s0 = inlined_call_operand.vmem [shape: f32[2,4,16], index: 0, kind: input, shape index: {}]   ;;  %s619_s1 = inlined_call_operand.vmem [shape: bf16[8,12], index: 1, kind: input, shape index: {}]   ;;  %s620_s2 = inlined_call_operand.vmem [shape: f32[8,3], index: 2, kind: input, shape index: {}]   ;;  %s621_s3 = inlined_call_operand.hbm [shape: f32[1,2,8,128], index: 3, kind: output, shape index: {}]  }
   0x1   :  { %v25_v0 = vld [vmem:[%s618_s0] sm:$0xf]  ;;  %v410_v3 = vld [vmem:[%s618_s0 + $0x4] sm:$0xf]  ;;  %18 = vst.msk [vmem:[#allocation2] sm:$0xf] %vm17_vm0, %v493_v9 }
   0x2   :  { %v44_v1 = vld [vmem:[%s618_s0] sm:$0xf]  ;;  %v418_v2 = vpack.c.bf16 %v25_v0, %v25_v0  ;;  %v414_v4 = vld [vmem:[%s618_s0 + $0x4] sm:$0xf]  ;;  %v421_v5 = vpack.c.bf16 %v410_v3, %v410_v3 }
   0x3   :  { %v35_v6 = vld [vmem:[%s618_s0] sm:$0xf]  ;;  %v420_v7 = vpack.c.bf16 %v44_v1, %v44_v1 }
   0x4   :  { %30 = vrot.lane.b32.xlu0 %v418_v2, %s492_s22  ;;  %v419_v8 = vpack.c.bf16 %v35_v6, %v35_v6 }
   0x5   :  { %8 = vsyncpa [#allocation4], 0  ;;  %219 = vrot.lane.b32.xlu1 %v421_v5, %s492_s22  ;;  %v423_v10 = vpack.c.bf16 %v414_v4, %v414_v4  ;;  %vm42_vm3 = vcmask 125954   ;;  %22 = vst.msk [vmem:[#allocation2] sm:$0xf] %vm21_vm1, %v493_v9  ;;  %vm23_vm4 = vcmask 1041528  }
   0x6   :  { %20 = vst.msk [vmem:[#allocation2 + $0x4] sm:$0x3] %vm19_vm2, %v493_v9  ;;  %v40_v11 = vrot.slane %v419_v8, 6  ;;  %v494_v12 = vmov 0.0   ;;  %vm495_vm5 = vmmov 0   ;;  %s496_s23 = smov 127  }
   0x7   :  { %24 = vst.msk [vmem:[#allocation2 + $0x4] sm:$0x3] %vm23_vm4, %v493_v9  ;;  %428 = vmatprep.subr.bf16.mxu0 %v494_v12  ;;  %434 = vmatprep.subr.bf16.mxu1 %v494_v12  ;;  %vm33_vm6 = vcmask 123912   ;;  %v412_v14 = vld [vmem:[%s618_s0 + $0x4] sm:$0xf]  ;;  %vm52_vm7 = vcmask 115712  }
   0x8   :  { %430 = vmatprep.mubr.msk.bf16.mxu0 %vm495_vm5, %v494_v12  ;;  %436 = vmatprep.mubr.msk.bf16.mxu1 %vm495_vm5, %v494_v12  ;;  %43 = vst.msk [vmem:[#allocation2] sm:$0xc] %vm42_vm3, %v40_v11  ;;  %v422_v15 = vpack.c.bf16 %v412_v14, %v412_v14  ;;  %vm66_vm8 = vcmask 1045504   ;;  %v54_v24 = vld [vmem:[%s619_s1] sm:$0xf]  ;;  %vm62_vm9 = vcmask 97280  }
   0x9   :  { %49 = vrot.lane.b32.xlu0 %v420_v7, %s496_s23  ;;  %236 = vrot.lane.b32.xlu1 %v423_v10, %s496_s23  ;;  %v240_v27 = vld [vmem:[%s619_s1] sm:$0xf]  ;;  %vm141_vm10 = vcmask 1043456   ;;  %s500_s30 = smov [#allocation3]  }
   0xa   :  { %v228_v18 = vrot.slane %v422_v15, 6  ;;  %v576_v38 = vld [vmem:[%s620_s2] sm:$0xff]  ;;  %s498_s2 = smov 2   ;;  %s394_s4 = sshll.u32 %s500_s30, 4  ;;  %s395_s4 = int_to_ptr.vmem [resolvable:$true] %s394_s4 }
   0xb   :  { %v116_v39 = vmul.f32 16.0, %v576_v38  ;;  %v118_v40 = vmul.f32 2.0, %v576_v38  ;;  %v121_v41 = vmul.f32 %v576_v38, %v576_v38  ;;  %s468_s5 = scalar_lea.vmem %s395_s4, 256  ;;  %p473_p1 = scmp.lt.s32.totalorder %s395_s4, %s395_s4 }
   0xc   :  { %p469_p0 = scmp.ne.s32.totalorder %s395_s4, %s468_s5  ;;  %p474_p2 = scmp.lt.s32.totalorder %s468_s5, %s468_s5 }
   0xd   :  { %v122_v47 = vmul.f32 16.0, %v121_v41 }
   0xe   :  { %p475_p3 = por %p474_p2, %p473_p1 }
  0x10   :  { %p476_p4 = pnand %p475_p3, %p469_p0 }
  0x76   :  { %v31_v13 = vpop.permute.xlu0 %30 }
  0x77   :  { %34 = vst.msk [vmem:[#allocation2] sm:$0x3] %vm33_vm6, %v31_v13  ;;  %v220_v17 = vpop.permute.xlu1 %219 }
  0x7b   :  { %v50_v16 = vpop.permute.xlu0 %49  ;;  %v237_v21 = vpop.permute.xlu1 %236 }
  0x7c   :  { %53 = vst.msk [vmem:[#allocation2 + $0x4] sm:$0x3] %vm52_vm7, %v50_v16 }
  0x7e   :  { %v55_v19 = vld [vmem:[#allocation2] sm:$0xf] }
  0x7f   :  { %209 = vst.msk [vmem:[#allocation2] sm:$0xf] %vm17_vm0, %v493_v9 }
  0x80   :  { %211 = vst.msk [vmem:[#allocation2] sm:$0xf] %vm21_vm1, %v493_v9 }
  0x81   :  { %222 = vst.msk [vmem:[#allocation2] sm:$0x3] %vm33_vm6, %v220_v17 }
  0x82   :  { %230 = vst.msk [vmem:[#allocation2] sm:$0xc] %vm42_vm3, %v228_v18 }
  0x83   :  { %v56_v20 = vld [vmem:[#allocation2 + $0x4] sm:$0x3] }
  0x84   :  { %210 = vst.msk [vmem:[#allocation2 + $0x4] sm:$0x3] %vm19_vm2, %v493_v9  ;;  %v408_v22 = vcombine.low %v55_v19, %v56_v20 }
  0x85   :  { %212 = vst.msk [vmem:[#allocation2 + $0x4] sm:$0x3] %vm23_vm4, %v493_v9 }
  0x86   :  { %239 = vst.msk [vmem:[#allocation2 + $0x4] sm:$0x3] %vm52_vm7, %v237_v21  ;;  %v68_v23 = vsel %vm66_vm8, %v408_v22, 0 }
  0x87   :  { %429 = vmatpush3.bf16.msra.mxu0 %v68_v23 }
  0x8a   :  { %431 = vmatmul.mubr.msk.bf16.vlgmr.msra.gmra.mrb[0].mxu0 %vm62_vm9, %v54_v24 }
  0x8d   :  { %v455_v25 = vld [vmem:[#allocation2] sm:$0x3f]  }
  0x8e   :  { %v252_v26 = vsel %vm66_vm8, %v455_v25, 0 }
  0x8f   :  { %435 = vmatpush3.bf16.msra.mxu1 %v252_v26 }
  0x92   :  { %437 = vmatmul.mubr.msk.bf16.vlgmr.msra.gmra.mrb[0].mxu1 %vm62_vm9, %v240_v27 }
 0x15d   :  { %v563_v28 = vpop.f32.mrb[0].mxu0 }
 0x15e   :  { %111 = vadd.xlane.f32.xlu0 %v563_v28  ;;  %v432_v29 = vpop.f32.mrb[1].mxu0  ;;  %v113_v30 = vmul.f32 %v563_v28, %v563_v28 }
 0x15f   :  { %v107_v31 = vpop.f32.mrb[2].mxu0 }
 0x160   :  { %v433_v32 = vpop.f32.mrb[3].mxu0 }
 0x162   :  { %114 = vadd.xlane.f32.xlu0 %v113_v30 }
 0x165   :  { %v568_v33 = vpop.f32.mrb[0].mxu1 }
 0x166   :  { %296 = vadd.xlane.f32.xlu1 %v568_v33  ;;  %v438_v34 = vpop.f32.mrb[1].mxu1  ;;  %v298_v35 = vmul.f32 %v568_v33, %v568_v33 }
 0x167   :  { %v291_v36 = vpop.f32.mrb[2].mxu1 }
 0x168   :  { %v439_v37 = vpop.f32.mrb[3].mxu1  ;;  %299 = vadd.xlane.f32.xlu0 %v298_v35 }
 0x1eb   :  { %v112_v42 = vpop.xlane.xlu0 %111 }
 0x1ec   :  { %v117_v43 = vadd.f32 %v116_v39, %v112_v42  ;;  %v119_v44 = vmul.f32 %v118_v40, %v112_v42 }
 0x1ee   :  { %v124_v45 = vsel %vm17_vm0, %v117_v43, 0.0  ;;  %v132_v46 = vrot.slane %v117_v43, 4 }
 0x1ef   :  { %v125_v48 = vrot.slane %v124_v45, 4  ;;  %v115_v49 = vpop.xlane.xlu0 %114 }
 0x1f0   :  { %v134_v50 = vsel %vm17_vm0, %v132_v46, 0.0  ;;  %v120_v51 = vadd.f32 %v119_v44, %v115_v49 }
 0x1f1   :  { %v126_v52 = vadd.f32 %v125_v48, %v124_v45  ;;  %v135_v53 = vrot.slane %v134_v50, 4 }
 0x1f2   :  { %v123_v54 = vadd.f32 %v122_v47, %v120_v51 }
 0x1f3   :  { %v127_v55 = vrot.slane %v126_v52, 2  ;;  %v136_v56 = vadd.f32 %v135_v53, %v134_v50  ;;  %v297_v59 = vpop.xlane.xlu1 %296 }
 0x1f4   :  { %v144_v57 = vsel %vm17_vm0, %v123_v54, 0.0  ;;  %v152_v58 = vrot.slane %v123_v54, 4  ;;  %v301_v63 = vadd.f32 %v297_v59, %v116_v39  ;;  %v302_v1 = vmul.f32 %v297_v59, %v118_v40 }
 0x1f5   :  { %v128_v60 = vadd.f32 %v127_v55, %v126_v52  ;;  %v137_v61 = vrot.slane %v136_v56, 2  ;;  %v145_v62 = vrot.slane %v144_v57, 4  ;;  %v300_v2 = vpop.xlane.xlu0 %299 }
 0x1f6   :  { %v154_v0 = vsel %vm17_vm0, %v152_v58, 0.0  ;;  %v305_v7 = vsel %vm17_vm0, %v301_v63, 0.0  ;;  %v313_v8 = vrot.slane %v301_v63, 4  ;;  %v303_v9 = vadd.f32 %v302_v1, %v300_v2 }
 0x1f7   :  { %v129_v3 = vrot.slane %v128_v60, 1  ;;  %v138_v4 = vadd.f32 %v137_v61, %v136_v56  ;;  %v146_v5 = vadd.f32 %v145_v62, %v144_v57  ;;  %v155_v6 = vrot.slane %v154_v0, 4 }
 0x1f8   :  { %v306_v14 = vrot.slane %v305_v7, 4  ;;  %v315_v15 = vsel %vm17_vm0, %v313_v8, 0.0  ;;  %v304_v16 = vadd.f32 %v303_v9, %v122_v47  ;;  %v497_v8 = vmov 1  }
 0x1f9   :  { %v139_v10 = vrot.slane %v138_v4, 1  ;;  %v147_v11 = vrot.slane %v146_v5, 2  ;;  %v156_v12 = vadd.f32 %v155_v6, %v154_v0  ;;  %v130_v13 = vadd.f32 %v129_v3, %v128_v60  ;;  %451 = vset.pattern.permute.xlu0 %v497_v8  ;;  %452 = vset.pattern.permute.xlu1 %v497_v8 }
 0x1fa   :  { %v316_v20 = vrot.slane %v315_v15, 4  ;;  %v307_v21 = vadd.f32 %v306_v14, %v305_v7  ;;  %v324_v22 = vsel %vm17_vm0, %v304_v16, 0.0  ;;  %v332_v23 = vrot.slane %v304_v16, 4 }
 0x1fb   :  { %v140_v17 = vadd.f32 %v139_v10, %v138_v4  ;;  %v148_v18 = vadd.f32 %v147_v11, %v146_v5  ;;  %v157_v19 = vrot.slane %v156_v12, 2  ;;  %v325_v30 = vrot.slane %v324_v22, 4 }
 0x1fc   :  { %v317_v27 = vadd.f32 %v316_v20, %v315_v15  ;;  %v308_v29 = vrot.slane %v307_v21, 2  ;;  %v334_v31 = vsel %vm17_vm0, %v332_v23, 0.0 }
 0x1fd   :  { %v142_v24 = vsel %vm141_vm10, %v130_v13, %v140_v17  ;;  %v149_v25 = vrot.slane %v148_v18, 1  ;;  %v158_v26 = vadd.f32 %v157_v19, %v156_v12  ;;  %v335_v35 = vrot.slane %v334_v31, 4 }
 0x1fe   :  { %v318_v34 = vrot.slane %v317_v27, 2  ;;  %v143_v36 = vmul.f32 0.015625, %v142_v24  ;;  %v309_v37 = vadd.f32 %v308_v29, %v307_v21  ;;  %v326_v39 = vadd.f32 %v325_v30, %v324_v22 }
 0x1ff   :  { %v159_v32 = vrot.slane %v158_v26, 1  ;;  %v150_v40 = vadd.f32 %v149_v25, %v148_v18  ;;  %v336_v43 = vadd.f32 %v335_v35, %v334_v31  ;;  %v499_v19 = vmov 2  }
 0x200   :  { %v319_v42 = vadd.f32 %v318_v34, %v317_v27  ;;  %v310_v44 = vrot.slane %v309_v37, 1  ;;  %v327_v45 = vrot.slane %v326_v39, 2  ;;  %v163_v49 = vmul.f32 %v143_v36, %v143_v36 }
 0x201   :  { %v160_v41 = vadd.f32 %v159_v32, %v158_v26  ;;  %v337_v48 = vrot.slane %v336_v43, 2  ;;  %v173_v13 = vsub.f32 %v576_v38, %v143_v36 }
 0x202   :  { %v320_v47 = vrot.slane %v319_v42, 1  ;;  %v328_v51 = vadd.f32 %v327_v45, %v326_v39  ;;  %v311_v52 = vadd.f32 %v310_v44, %v309_v37 }
 0x203   :  { %v161_v46 = vsel %vm141_vm10, %v150_v40, %v160_v41  ;;  %v338_v54 = vadd.f32 %v337_v48, %v336_v43 }
 0x204   :  { %v162_v50 = vmul.f32 0.015625, %v161_v46  ;;  %v321_v53 = vadd.f32 %v320_v47, %v319_v42  ;;  %v329_v56 = vrot.slane %v328_v51, 1 }
 0x205   :  { %v339_v58 = vrot.slane %v338_v54, 1 }
 0x206   :  { %v164_v55 = vsub.f32 %v162_v50, %v163_v49  ;;  %v322_v57 = vsel %vm141_vm10, %v311_v52, %v321_v53  ;;  %v330_v61 = vadd.f32 %v329_v56, %v328_v51 }
 0x207   :  { %v323_v60 = vmul.f32 0.015625, %v322_v57  ;;  %v340_v62 = vadd.f32 %v339_v58, %v338_v54 }
 0x208   :  { %v165_v59 = vmax.f32 %v164_v55, 0.0 }
 0x209   :  { %v341_v0 = vsel %vm141_vm10, %v330_v61, %v340_v62  ;;  %v343_v1 = vmul.f32 %v323_v60, %v323_v60  ;;  %v353_v16 = vsub.f32 %v576_v38, %v323_v60 }
 0x20a   :  { %v166_v63 = vadd.f32 1e-05, %v165_v59  ;;  %v342_v2 = vmul.f32 0.015625, %v341_v0 }
 0x20c   :  { %456 = vrsqrt.f32 %v166_v63  ;;  %v344_v3 = vsub.f32 %v342_v2, %v343_v1 }
 0x20e   :  { %v345_v4 = vmax.f32 %v344_v3, 0.0 }
 0x210   :  { %v346_v5 = vadd.f32 1e-05, %v345_v4 }
 0x212   :  { %458 = vrsqrt.f32 %v346_v5 }
 0x216   :  { %v457_v6 = vpop.eup %456 }
 0x217   :  { %169 = vrot.lane.b32.xlu1 %v457_v6, %s492_s22 }
 0x21c   :  { %v459_v7 = vpop.eup %458 }
 0x21d   :  { %349 = vrot.lane.b32.xlu0 %v459_v7, %s492_s22 }
 0x289   :  { %v170_v9 = vpop.permute.xlu1 %169 }
 0x28a   :  { %v172_v10 = vmul.f32 %v170_v9, %v576_v38 }
 0x28c   :  { %175 = vrot.lane.b32.xlu1 %v172_v10, %s496_s23 }
 0x28f   :  { %v350_v11 = vpop.permute.xlu0 %349 }
 0x290   :  { %v352_v12 = vmul.f32 %v350_v11, %v576_v38 }
 0x292   :  { %355 = vrot.lane.b32.xlu1 %v352_v12, %s496_s23 }
 0x2fe   :  { %v176_v14 = vpop.permute.xlu1 %175 }
 0x2ff   :  { %v178_v15 = vmul.f32 %v176_v14, %v173_v13 }
 0x301   :  { %180 = vrot.lane.b32.xlu0 %v178_v15, %s498_s2 }
 0x304   :  { %v356_v17 = vpop.permute.xlu1 %355 }
 0x305   :  { %186 = vperm.xlu0 %451, %v172_v10   ;;  %v358_v18 = vmul.f32 %v356_v17, %v353_v16 }
 0x307   :  { %360 = vrot.lane.b32.xlu1 %v358_v18, %s498_s2 }
 0x309   :  { %454 = vset.pattern.permute.xlu0 %v499_v19 }
 0x30b   :  { %366 = vperm.xlu1 %452, %v352_v12  }
 0x30f   :  { %453 = vset.pattern.permute.xlu1 %v499_v19 }
 0x373   :  { %v181_v20 = vpop.permute.xlu0 %180 }
 0x374   :  { %v183_v21 = vadd.f32 %v181_v20, %v576_v38 }
 0x376   :  { %192 = vperm.xlu1 %453, %v183_v21  }
 0x379   :  { %v361_v22 = vpop.permute.xlu1 %360 }
 0x37a   :  { %v363_v23 = vadd.f32 %v361_v22, %v576_v38 }
 0x37c   :  { %372 = vperm.xlu0 %454, %v363_v23  }
 0x384   :  { %v187_v24 = vpop.permute.xlu0 %186 }
 0x385   :  { %v189_v26 = vmul.f32 %v187_v24, %v563_v28 }
 0x38a   :  { %v367_v25 = vpop.permute.xlu1 %366 }
 0x38b   :  { %v369_v32 = vmul.f32 %v367_v25, %v568_v33 }
 0x3f5   :  { %v193_v27 = vpop.permute.xlu1 %192 }
 0x3f6   :  { %v195_v29 = vadd.f32 %v193_v27, %v189_v26 }
 0x3f8   :  { %v196_v30 = vmin.f32 %v195_v29, 20.0 }
 0x3fa   :  { %v197_v31 = vmul.f32 1.442695, %v196_v30 }
 0x3fb   :  { %v373_v34 = vpop.permute.xlu0 %372 }
 0x3fc   :  { %460 = vpow2.f32 %v197_v31  ;;  %v375_v35 = vadd.f32 %v373_v34, %v369_v32 }
 0x3fe   :  { %v376_v36 = vmin.f32 %v375_v35, 20.0 }
 0x400   :  { %v377_v37 = vmul.f32 1.442695, %v376_v36 }
 0x402   :  { %462 = vpow2.f32 %v377_v37 }
 0x406   :  { %v461_v39 = vpop.eup %460 }
 0x407   :  { %v199_v40 = vadd.f32 2.0, %v461_v39 }
 0x409   :  { %v200_v38 = vmul.f32 %v461_v39, %v199_v40 }
 0x40b   :  { %v201_v41 = vadd.f32 2.0, %v200_v38 }
 0x40c   :  { %v463_v42 = vpop.eup %462 }
 0x40d   :  { %464 = vrcp.f32 %v201_v41  ;;  %v379_v43 = vadd.f32 2.0, %v463_v42 }
 0x40f   :  { %v380_v28 = vmul.f32 %v463_v42, %v379_v43 }
 0x411   :  { %v381_v44 = vadd.f32 2.0, %v380_v28 }
 0x413   :  { %466 = vrcp.f32 %v381_v44 }
 0x417   :  { %v465_v45 = vpop.eup %464 }
 0x418   :  { %v203_v46 = vmul.f32 %v465_v45, %v201_v41 }
 0x41a   :  { %v204_v47 = vsub.f32 2.0, %v203_v46 }
 0x41c   :  { %v205_v33 = vmul.f32 %v465_v45, %v204_v47 }
 0x41d   :  { %v467_v49 = vpop.eup %466 }
 0x41e   :  { %v206_v48 = vmul.f32 %v205_v33, %v200_v38  ;;  %v383_v51 = vmul.f32 %v467_v49, %v381_v44 }
 0x420   :  { %v207_v50 = vmul.f32 %v206_v48, %v195_v29  ;;  %v384_v52 = vsub.f32 2.0, %v383_v51 }
 0x422   :  { %208 = vst [vmem:[#allocation3] sm:$0xff] %v207_v50  ;;  %v385_v53 = vmul.f32 %v467_v49, %v384_v52 }
 0x424   :  { %v386_v54 = vmul.f32 %v385_v53, %v380_v28 }
 0x426   :  { %v387_v55 = vmul.f32 %v386_v54, %v375_v35 }
 0x428   :  { %388 = vst [vmem:[#allocation3 + $0x8] sm:$0xff] %v387_v55 }
 0x429   :  { %479 = shalt.err (!%p476_p4)
}
 0x42a   :  { %s480_s8 = scalar_lea.hbm %s621_s3, 256 }
 0x42b   :  { %p481_p5 = scmp.ne.s32.totalorder %s621_s3, %s480_s8  ;;  %p484_p6 = scmp.lt.u32.totalorder %s480_s8, %s621_s3 }
 0x42d   :  { %p486_p7 = pnand %p484_p6, %p481_p5 }
 0x42f   :  { %489 = shalt.err (!%p486_p7)
}
 0x430   :  { %s501_s13 = smov 128   ;;  %s502_s14 = smov 8  }
 0x431   :  { %400 = dma.vmem_to_hbm [thread:$0]  %s395_s4, 256, %s621_s3, [#allocation4], %s501_s13, %s501_s13, %s502_s14  }
 0x432   :  { %490 = dma.done.wait [#allocation4], 256  }
 0x433   :  { %491 = vsyncadd [#allocation4], 4294967040 }
 0x434   :  { %404 = vsyncpa [#allocation4], 1 }

</bundles_post_ra>
